<compile_context>
chip_gen: v5e
topology: v5e:2x2
jax: 0.10.0
libtpu: 0.0.40
codegen_flags: <defaults>
</compile_context>

<pallas_src>
import functools

import jax
import jax.numpy as jnp
from jax import lax
from jax.experimental import pallas as pl
from jax.experimental.pallas import tpu as pltpu

_LANE = 128
_SUB = 16       # sublane multiple that satisfies both f32 (8) and bf16 (16) tiling
_NCORES = 2     # leading "parallel" grid axis (uses both TCs on megacore parts)


def _iou_partial_kernel(x_ref, t_ref, out_ref, *,
                        rows, block_rows, tiles_per_core, needs_mask):
    """Accumulates per-core partial sums into a resident VMEM output block.

    out_ref block: (1, 2, 8, 128) f32
      channel 0: running sum(x * t)   (intersection)
      channel 1: running sum(x + t)   (total)
    """
    c = pl.program_id(0)      # core / stream half
    i = pl.program_id(1)      # row-tile within this half

    @pl.when(i == 0)
    def _init():
        out_ref[...] = jnp.zeros_like(out_ref)

    x = x_ref[...].astype(jnp.float32)
    t = t_ref[...].astype(jnp.float32)

    if needs_mask:
        # True (unclamped) tile index; rows past the end of the data (ragged
        # last tile, or the duplicate tile read by the second half when the
        # tile count is odd) are zeroed with a select (NaN-safe).
        g = c * tiles_per_core + i
        valid = rows - g * block_rows
        row_ids = lax.broadcasted_iota(jnp.int32, x.shape, 0)
        keep = row_ids < valid
        x = jnp.where(keep, x, 0.0)
        t = jnp.where(keep, t, 0.0)

    # Fold the (block_rows, 128) tile into an (8, 128) vreg-shaped partial sum
    # with pure VPU adds; the cross-lane reduction happens once, in the wrapper.
    prod = (x * t).reshape(-1, 8, _LANE).sum(axis=0)
    tot = (x + t).reshape(-1, 8, _LANE).sum(axis=0)
    out_ref[0, 0] += prod
    out_ref[0, 1] += tot


def _kernel_friendly(a):
    # f32 / bf16 stream through uncast; anything else is promoted in the wrapper.
    return a if a.dtype in (jnp.float32, jnp.bfloat16) else a.astype(jnp.float32)


def iou_loss(inputs, targets, smooth=1e-10, block_rows=2048):
    """Pallas equivalent of IoULoss().forward(inputs, targets, smooth)."""
    x = _kernel_friendly(inputs.reshape(-1))
    t = _kernel_friendly(targets.reshape(-1))

    n = x.shape[0]
    unit = _SUB * _LANE
    n_pad = pl.cdiv(n, unit) * unit
    pad = n_pad - n
    if pad:
        # Only pads up to unit-1 elements (zeros are sum-safe); skipped
        # entirely when n is already a multiple of 16*128.
        x = jnp.pad(x, (0, pad))
        t = jnp.pad(t, (0, pad))

    rows = n_pad // _LANE
    block_rows = max(min(block_rows, rows), _SUB)
    block_rows -= block_rows % _SUB          # keep bf16 (16,128) min tile legal
    num_tiles = pl.cdiv(rows, block_rows)
    tiles_per_core = pl.cdiv(num_tiles, _NCORES)
    needs_mask = (rows % block_rows != 0) or (num_tiles != _NCORES * tiles_per_core)

    def in_index_map(c, i):
        g = c * tiles_per_core + i
        # Clamp so no block window starts past the end of the array; the
        # duplicate tile this produces (odd tile count) is masked in-kernel.
        return (jnp.minimum(g, num_tiles - 1), 0)

    kernel = functools.partial(
        _iou_partial_kernel,
        rows=rows,
        block_rows=block_rows,
        tiles_per_core=tiles_per_core,
        needs_mask=needs_mask,
    )

    partials = pl.pallas_call(
        kernel,
        out_shape=jax.ShapeDtypeStruct((_NCORES, 2, 8, _LANE), jnp.float32),
        grid_spec=pltpu.PrefetchScalarGridSpec(
            num_scalar_prefetch=0,
            grid=(_NCORES, tiles_per_core),
            in_specs=[
                pl.BlockSpec((block_rows, _LANE), in_index_map),
                pl.BlockSpec((block_rows, _LANE), in_index_map),
            ],
            out_specs=pl.BlockSpec((1, 2, 8, _LANE), lambda c, i: (c, 0, 0, 0)),
        ),
        compiler_params=pltpu.CompilerParams(
            dimension_semantics=("parallel", "arbitrary"),
            vmem_limit_bytes=32 * 1024 * 1024,
        ),
        cost_estimate=pl.CostEstimate(
            flops=4 * n,
            transcendentals=0,
            bytes_accessed=n * (x.dtype.itemsize + t.dtype.itemsize)
            + _NCORES * 2 * 8 * _LANE * 4,
        ),
    )(x.reshape(rows, _LANE), t.reshape(rows, _LANE))

    # Tiny epilogue in plain JAX: combine per-core vector partials, then the
    # scalar loss math (keeps `smooth` out of the kernel entirely).
    intersection = jnp.sum(partials[:, 0])
    total = jnp.sum(partials[:, 1])
    union = total - intersection
    iou = (intersection + smooth) / (union + smooth)
    return 1.0 - iou


def _reference_iou_loss(inputs, targets, smooth=1e-10):
    x = inputs.reshape(-1).astype(jnp.float32)
    t = targets.reshape(-1).astype(jnp.float32)
    intersection = jnp.sum(x * t)
    total = jnp.sum(x + t)
    union = total - intersection
    return 1.0 - (intersection + smooth) / (union + smooth)


if __name__ == "__main__":
    key = jax.random.PRNGKey(0)
    k1, k2 = jax.random.split(key)
    # Small segmentation-style shapes: [B, C, H, W]
    shape = (2, 4, 16, 16)
    inputs = jax.nn.sigmoid(jax.random.normal(k1, shape, dtype=jnp.float32))
    targets = (jax.random.uniform(k2, shape) > 0.5).astype(jnp.float32)

    loss = jax.block_until_ready(iou_loss(inputs, targets))
    ref = _reference_iou_loss(inputs, targets)
    assert jnp.allclose(loss, ref, rtol=1e-5, atol=1e-6), (loss, ref)

    print("KERNEL_OK")
</pallas_src>

<mosaic_0001>
module attributes {stable_mosaic.version = 11 : i64} {
  func.func @_iou_partial_kernel(%arg0: i32, %arg1: i32, %arg2: memref<16x128xf32, #tpu.memory_space<vmem>>, %arg3: memref<16x128xf32, #tpu.memory_space<vmem>>, %arg4: memref<1x2x8x128xf32, #tpu.memory_space<vmem>>) attributes {dimension_semantics = [#tpu.dimension_semantics<parallel>, #tpu.dimension_semantics<arbitrary>], iteration_bounds = array<i64: 2, 1>, scalar_prefetch = 0 : i64, scratch_operands = 0 : i64, tpu.core_type = #tpu.core_type<tc>, window_params = [{transform_indices = @transform_0, window_bounds = array<i64: 16, 128>}, {transform_indices = @transform_1, window_bounds = array<i64: 16, 128>}, {transform_indices = @transform_2, window_bounds = array<i64: 1, 2, 8, 128>}]} {
    %c0_i32 = arith.constant 0 : i32
    %0 = arith.cmpi eq, %arg1, %c0_i32 : i32
    %1 = arith.extui %0 : i1 to i32
    %c0_i32_0 = arith.constant 0 : i32
    %2 = arith.cmpi ne, %1, %c0_i32_0 : i32
    scf.if %2 {
      %cst_23 = arith.constant 0.000000e+00 : f32
      %34 = vector.broadcast %cst_23 : f32 to vector<1x2x8x128xf32>
      %c0_24 = arith.constant 0 : index
      %c0_25 = arith.constant 0 : index
      %c0_26 = arith.constant 0 : index
      %c0_27 = arith.constant 0 : index
      %35 = vector.load %arg4[%c0_24, %c0_25, %c0_26, %c0_27] : memref<1x2x8x128xf32, #tpu.memory_space<vmem>>, vector<1x2x8x128xf32>
      tpu.vector_store %arg4[%c0_24, %c0_25, %c0_26, %c0_27], %34 {strides = array<i32>} : memref<1x2x8x128xf32, #tpu.memory_space<vmem>>, vector<1x2x8x128xf32>,
    } else {
    }
    %c0 = arith.constant 0 : index
    %c0_1 = arith.constant 0 : index
    %3 = vector.load %arg2[%c0, %c0_1] : memref<16x128xf32, #tpu.memory_space<vmem>>, vector<16x128xf32>
    %c0_2 = arith.constant 0 : index
    %c0_3 = arith.constant 0 : index
    %4 = vector.load %arg3[%c0_2, %c0_3] : memref<16x128xf32, #tpu.memory_space<vmem>>, vector<16x128xf32>
    %c1_i32 = arith.constant 1 : i32
    %5 = arith.muli %arg0, %c1_i32 : i32
    %6 = arith.addi %5, %arg1 : i32
    %c16_i32 = arith.constant 16 : i32
    %7 = arith.muli %6, %c16_i32 : i32
    %c16_i32_4 = arith.constant 16 : i32
    %8 = arith.subi %c16_i32_4, %7 : i32
    %9 = tpu.iota {dimensions = array<i32: 0>} : vector<16x128xi32>
    %10 = vector.broadcast %8 : i32 to vector<16x128xi32>
    %11 = arith.cmpi slt, %9, %10 : vector<16x128xi32>
    %cst = arith.constant 0.000000e+00 : f32
    %12 = vector.broadcast %cst : f32 to vector<16x128xf32>
    %13 = arith.select %11, %3, %12 : vector<16x128xi1>, vector<16x128xf32>
    %cst_5 = arith.constant 0.000000e+00 : f32
    %14 = vector.broadcast %cst_5 : f32 to vector<16x128xf32>
    %15 = arith.select %11, %4, %14 : vector<16x128xi1>, vector<16x128xf32>
    %16 = arith.mulf %13, %15 : vector<16x128xf32>
    %17 = vector.shape_cast %16 : vector<16x128xf32> to vector<2x8x128xf32>
    %cst_6 = arith.constant dense<0.000000e+00> : vector<8x128xf32>
    %18 = vector.multi_reduction <add>, %17, %cst_6 [0] : vector<2x8x128xf32> to vector<8x128xf32>
    %19 = arith.addf %13, %15 : vector<16x128xf32>
    %20 = vector.shape_cast %19 : vector<16x128xf32> to vector<2x8x128xf32>
    %cst_7 = arith.constant dense<0.000000e+00> : vector<8x128xf32>
    %21 = vector.multi_reduction <add>, %20, %cst_7 [0] : vector<2x8x128xf32> to vector<8x128xf32>
    %c0_8 = arith.constant 0 : index
    %c0_9 = arith.constant 0 : index
    %c0_10 = arith.constant 0 : index
    %c0_11 = arith.constant 0 : index
    %22 = vector.load %arg4[%c0_8, %c0_9, %c0_10, %c0_11] : memref<1x2x8x128xf32, #tpu.memory_space<vmem>>, vector<1x1x8x128xf32>
    %23 = vector.shape_cast %22 : vector<1x1x8x128xf32> to vector<8x128xf32>
    %24 = arith.addf %23, %18 : vector<8x128xf32>
    %c0_12 = arith.constant 0 : index
    %c0_13 = arith.constant 0 : index
    %c0_14 = arith.constant 0 : index
    %c0_15 = arith.constant 0 : index
    %25 = vector.load %arg4[%c0_12, %c0_13, %c0_14, %c0_15] : memref<1x2x8x128xf32, #tpu.memory_space<vmem>>, vector<1x1x8x128xf32>
    %26 = vector.shape_cast %25 : vector<1x1x8x128xf32> to vector<8x128xf32>
    %27 = vector.shape_cast %24 : vector<8x128xf32> to vector<1x1x8x128xf32>
    tpu.vector_store %arg4[%c0_12, %c0_13, %c0_14, %c0_15], %27 {strides = array<i32>} : memref<1x2x8x128xf32, #tpu.memory_space<vmem>>, vector<1x1x8x128xf32>,
    %c0_16 = arith.constant 0 : index
    %c1 = arith.constant 1 : index
    %c0_17 = arith.constant 0 : index
    %c0_18 = arith.constant 0 : index
    %28 = vector.load %arg4[%c0_16, %c1, %c0_17, %c0_18] : memref<1x2x8x128xf32, #tpu.memory_space<vmem>>, vector<1x1x8x128xf32>
    %29 = vector.shape_cast %28 : vector<1x1x8x128xf32> to vector<8x128xf32>
    %30 = arith.addf %29, %21 : vector<8x128xf32>
    %c0_19 = arith.constant 0 : index
    %c1_20 = arith.constant 1 : index
    %c0_21 = arith.constant 0 : index
    %c0_22 = arith.constant 0 : index
    %31 = vector.load %arg4[%c0_19, %c1_20, %c0_21, %c0_22] : memref<1x2x8x128xf32, #tpu.memory_space<vmem>>, vector<1x1x8x128xf32>
    %32 = vector.shape_cast %31 : vector<1x1x8x128xf32> to vector<8x128xf32>
    %33 = vector.shape_cast %30 : vector<8x128xf32> to vector<1x1x8x128xf32>
    tpu.vector_store %arg4[%c0_19, %c1_20, %c0_21, %c0_22], %33 {strides = array<i32>} : memref<1x2x8x128xf32, #tpu.memory_space<vmem>>, vector<1x1x8x128xf32>,
    return
  }
  func.func @transform_0(%arg0: i32, %arg1: i32) -> (i32, i32) {
    %c1_i32 = arith.constant 1 : i32
    %0 = arith.muli %arg0, %c1_i32 : i32
    %1 = arith.addi %0, %arg1 : i32
    %c0_i32 = arith.constant 0 : i32
    %2 = arith.minsi %1, %c0_i32 : i32
    %c0_i32_0 = arith.constant 0 : i32
    %c0_i32_1 = arith.constant 0 : i32
    return %2, %c0_i32_0 : i32, i32
  }
  func.func @transform_1(%arg0: i32, %arg1: i32) -> (i32, i32) {
    %c1_i32 = arith.constant 1 : i32
    %0 = arith.muli %arg0, %c1_i32 : i32
    %1 = arith.addi %0, %arg1 : i32
    %c0_i32 = arith.constant 0 : i32
    %2 = arith.minsi %1, %c0_i32 : i32
    %c0_i32_0 = arith.constant 0 : i32
    %c0_i32_1 = arith.constant 0 : i32
    return %2, %c0_i32_0 : i32, i32
  }
  func.func @transform_2(%arg0: i32, %arg1: i32) -> (i32, i32, i32, i32) {
    %c0_i32 = arith.constant 0 : i32
    %c0_i32_0 = arith.constant 0 : i32
    %c0_i32_1 = arith.constant 0 : i32
    %c0_i32_2 = arith.constant 0 : i32
    return %arg0, %c0_i32, %c0_i32_0, %c0_i32_1 : i32, i32, i32, i32
  }
}

</mosaic_0001>

<bundles_post_ra>
// kernel: tpu_custom_call.1
= control target key start
LH: loop header
LB: loop body
LE: loop exit
PB: predicated region body
PF: predicated region fallthrough
CT: control target
= control target key end

     0   :  { %7 = vsyncpa [#allocation3], 0  ;;  %s883_s0 = inlined_call_operand.hbm [shape: f32[16,128], index: 0, kind: input, shape index: {}]   ;;  %s884_s1 = inlined_call_operand.hbm [shape: f32[16,128], index: 1, kind: input, shape index: {}]   ;;  %s885_s2 = inlined_call_operand.hbm [shape: f32[2,2,8,128], index: 2, kind: output, shape index: {}]  }
   0x1   :  { %9 = vsyncpa [#allocation3 + $0x1], 0 }
   0x2   :  { %10 = vsyncpa [#allocation6], 0 }
   0x3   :  { %12 = vsyncpa [#allocation6 + $0x1], 0 }
   0x4   :  { %13 = vsyncpa [#allocation4], 0 }
   0x5   :  { %15 = vsyncpa [#allocation4 + $0x1], 0  ;;  %s711_s9 = smov 0   ;;  %s713_s10 = smov 0  }
   0x6   :  { %s715_s11 = smov 0   ;;  %s717_s12 = smov 0  }
   0x7   :  { %s719_s13 = smov 0   ;;  %s721_s14 = smov 0  }
   0x8   :  { %s723_s15 = smov 0   ;;  %s725_s16 = smov 0  }
   0x9 LB: > { %s400_s17 = sadd.s32 4294967295, %s688_s16   ;;  %s401_s18 = sadd.s32 4294967294, %s688_s16   ;;  %s688_s16 = sphi %s725_s16, %s21_s16   ;;  %s684_s15 = sphi %s723_s15, %s897_s15   ;;  %s680_s14 = sphi %s721_s14, %s896_s14   ;;  %s676_s13 = sphi %s719_s13, %s873_s13   ;;  %s672_s12 = sphi %s717_s12, %s895_s12   ;;  %s668_s11 = sphi %s715_s11, %s894_s11   ;;  %s664_s10 = sphi %s713_s10, %s893_s10   ;;  %s660_s9 = sphi %s711_s9, %s892_s9  }
   0xa   : > { %s33_s19 = sadd.s32 1, %s684_s15  ;;  %p657_p1 = scmp.ne.s32.totalorder %s676_s13, 0 }
   0xb   : > { %p35_p0 = scmp.ge.s32.totalorder %s33_s19, 2  ;;  %p54_p2 = scmp.eq.s32.totalorder %s688_s16, 0 }
   0xc   : > { %p59_p3 = scmp.ne.s32.totalorder %s676_s13, %s672_s12  ;;  %p60_p5 = scmp.eq.s32.totalorder %s400_s17, 0 }
   0xd   : > { %s899_s19 = smov (%p35_p0, %s33_s19), 0  ;;  %p757_p4 = por %p657_p1, %p54_p2 }
   0xe   : > { %p761_p6 = por %p60_p5, %p59_p3  ;;  %s101_s22 = ssub.s32 %s684_s15, %s899_s19 }
   0xf   : > { %p102_p7 = scmp.eq.s32.totalorder %s101_s22, 0  ;;  %s104_s23 = sadd.s32 1, %s668_s11 }
  0x10   : > { %p114_p8 = scmp.ne.s32.totalorder %s668_s11, %s664_s10  ;;  %p115_p9 = scmp.eq.s32.totalorder %s400_s17, 1 }
  0x11   : > { %s769_s24 = scalar_select %p102_p7, %s668_s11, %s104_s23  }
  0x12   : > { %p120_p10 = scmp.ne.s32.totalorder %s664_s10, %s660_s9  ;;  %p121_p11 = scmp.eq.s32.totalorder %s401_s18, 1 }
  0x13   : > { %p775_p12 = por %p115_p9, %p114_p8  ;;  %p403_p13 = scmp.ge.s32.totalorder %s688_s16, 2 }
  0x14   : > { %p780_p0 = por %p121_p11, %p120_p10  ;;  %p442_p1 = scmp.lt.s32.totalorder %s688_s16, 2 }
  0x15   : > { %s154_s29 = sshll.u32 %s883_s0, 4  ;;  %s690_s30 = smov [#allocation2]   ;;  %s155_s29 = int_to_ptr.hbm [resolvable:$true] %s154_s29 }
  0x16   : > { %s156_s3 = sshll.u32 %s690_s30, 4  ;;  %p790_p2 = pnand %p442_p1, %p757_p4  ;;  %s157_s3 = int_to_ptr.vmem [resolvable:$true] %s156_s3 }
  0x17   : > { %p410_p3 = scmp.ge.s32.totalorder %s688_s16, 1  ;;  %p189_p5 = scmp.lt.s32.totalorder %s688_s16, 3 }
  0x18   : > { %s521_s5 = sshra.s32 %s155_s29, 4  ;;  %p525_p8 = pneg %p790_p2  ;;  %s522_s5 = int_to_ptr.hbm [resolvable:$true] %s521_s5 }
  0x19   : > { %s523_s6 = scalar_lea.hbm %s522_s5, 16  ;;  %s528_s12 = scalar_lea.hbm %s883_s0, 16 }
  0x1a   : > { %p524_p7 = scmp.ne.s32.totalorder %s522_s5, %s523_s6  ;;  %p530_p4 = scmp.lt.s32.totalorder %s528_s12, %s523_s6 }
  0x1c   : > { %p526_p9 = pnand %p525_p8, %p524_p7 }
  0x1e   : > { %p527_p10 = pneg %p526_p9 }
  0x20   : > { %p532_p11 = pnand %p530_p4, %p527_p10 }
  0x22   : > { %535 = shalt.err (!%p532_p11)
}
  0x23   : > { %s691_s17 = smov 128   ;;  %s692_s18 = smov 8  }
  0x24   : > { %434 = dma.hbm_to_vmem [thread:$0]  (!%p790_p2), %s155_s29, 256, %s157_s3, [#allocation3], %s691_s17, %s691_s17, %s692_s18  }
  0x25   : > { %p810_p1 = pnand %p410_p3, %p189_p5  ;;  %s179_s27 = sshll.u32 %s884_s1, 4  ;;  %s180_s27 = int_to_ptr.hbm [resolvable:$true] %s179_s27 }
  0x26   : > { %s693_s28 = smov [#allocation5]   ;;  %s551_s5 = sshra.s32 %s180_s27, 4  ;;  %s552_s5 = int_to_ptr.hbm [resolvable:$true] %s551_s5 }
  0x27   : > { %s181_s30 = sshll.u32 %s693_s28, 4  ;;  %s553_s6 = scalar_lea.hbm %s552_s5, 16  ;;  %s182_s30 = int_to_ptr.vmem [resolvable:$true] %s181_s30 }
  0x28   : > { %p554_p7 = scmp.ne.s32.totalorder %s552_s5, %s553_s6  ;;  %s558_s7 = scalar_lea.hbm %s884_s1, 16 }
  0x29   : > { %p560_p3 = scmp.lt.s32.totalorder %s558_s7, %s553_s6 }
  0x2a   : > { %p556_p9 = pnand %p554_p7, %p525_p8 }
  0x2c   : > { %p557_p10 = pneg %p556_p9 }
  0x2e   : > { %p562_p5 = pnand %p560_p3, %p557_p10 }
  0x30   : > { %565 = shalt.err (!%p562_p5)
}
  0x31   : > { %437 = dma.hbm_to_vmem [thread:$0]  (!%p790_p2), %s180_s27, 256, %s182_s30, [#allocation6], %s691_s17, %s691_s17, %s692_s18  }
  0x32   : > { %193 = sbr.rel (%p810_p1) target bundleno = 75 (0x4b), region = 28  ;;  %s195_s8 = sand.u32 (!%p810_p1), 1, %s676_s13  }
  0x33   : > { %s411_s12 = sshll.u32 (!%p810_p1), %s195_s8, 4  ;;  %s196_s22 = scalar_lea.sflag (!%p810_p1), [#allocation3], %s195_s8 }
  0x34   : > { %s199_s23 = scalar_lea.vmem (!%p810_p1), [#allocation2], %s411_s12 }
  0x37   : > { %646 = dma.done.wait (%p761_p6), %s196_s22, 256  }
  0x38   : > { %648 = vsyncadd (%p761_p6), %s196_s22, 4294967040  ;;  %s206_s28 = scalar_lea.sflag [#allocation6], %s195_s8  ;;  %s209_s5 = scalar_lea.vmem [#allocation5], %s411_s12 }
  0x39   : > { %650 = dma.done.wait (%p761_p6), %s206_s28, 256  }
  0x3a   : > { %652 = vsyncadd (%p761_p6), %s206_s28, 4294967040  ;;  %s414_s4 = sshll.u32 %s680_s14, 4  ;;  %v257_v0 = vlaneseq  ;;  %s233_s17 = sand.u32 1, %s664_s10   ;;  %v250_v4 = vld [vmem:[%s199_s23] sm:$0xff]  ;;  %v251_v5 = vld [vmem:[%s199_s23 + $0x8] sm:$0xff] }
  0x3b   : > { %s256_s18 = ssub.s32 16, %s414_s4  ;;  %s413_s20 = sshll.u32 %s233_s17, 4  ;;  %v252_v6 = vld [vmem:[%s209_s5] sm:$0xff]  ;;  %v253_v7 = vld [vmem:[%s209_s5 + $0x8] sm:$0xff] }
  0x3c   : > { %v258_v1 = vshrl.u32 %v257_v0, 7  ;;  %v260_v2 = vstv %s256_s18  ;;  %s292_s14 = scalar_lea.hbm %s885_s2, %s414_s4  ;;  %s235_s30 = scalar_lea.vmem [#allocation7], %s413_s20 }
  0x3d   : > { %s293_s6 = sshll.u32 %s235_s30, 4  ;;  %s295_s29 = sshll.u32 %s292_s14, 4  ;;  %s294_s6 = int_to_ptr.vmem [resolvable:$true] %s293_s6  ;;  %s296_s29 = int_to_ptr.hbm [resolvable:$true] %s295_s29 }
  0x3e   : > { %v259_v3 = vadd.s32 8, %v258_v1  ;;  %vm261_vm0 = vcmp.lt.s32.totalorder %v258_v1, %v260_v2  ;;  %s281_s3 = scalar_lea.sflag [#allocation4], %s233_s17  ;;  %s595_s7 = sshra.s32 %s296_s29, 4  ;;  %s596_s7 = int_to_ptr.hbm [resolvable:$true] %s595_s7 }
  0x3f   : > { %v263_v8 = vsel %vm261_vm0, %v250_v4, 0.0  ;;  %v265_v10 = vsel %vm261_vm0, %v252_v6, 0.0  ;;  %s597_s8 = scalar_lea.hbm %s596_s7, 16  ;;  %s601_s23 = scalar_lea.hbm %s885_s2, 32 }
  0x40   : > { %vm262_vm1 = vcmp.lt.s32.totalorder %v259_v3, %v260_v2  ;;  %v267_v12 = vmul.f32 %v265_v10, %v263_v8  ;;  %v270_v13 = vadd.f32 %v265_v10, %v263_v8  ;;  %p598_p6 = scmp.ne.s32.totalorder %s596_s7, %s597_s8  ;;  %p602_p4 = scmp.lt.s32.totalorder %s596_s7, %s885_s2 }
  0x41   : > { %v264_v9 = vsel %vm262_vm1, %v251_v5, 0.0  ;;  %v266_v11 = vsel %vm262_vm1, %v253_v7, 0.0  ;;  %p603_p11 = scmp.lt.s32.totalorder %s601_s23, %s597_s8 }
  0x42   : > { %v268_v14 = vmul.f32 %v266_v11, %v264_v9  ;;  %v271_v15 = vadd.f32 %v266_v11, %v264_v9  ;;  %p599_p2 = pnand %p598_p6, %p775_p12 }
  0x43   : > { %p604_p1 = por %p603_p11, %p602_p4 }
  0x44   : > { %v269_v16 = vadd.f32 %v268_v14, %v267_v12  ;;  %v272_v17 = vadd.f32 %v271_v15, %v270_v13  ;;  %p600_p8 = pneg %p599_p2 }
  0x46   : > { %275 = vst [vmem:[%s235_s30] sm:$0xff] %v269_v16  ;;  %p605_p7 = pnand %p604_p1, %p600_p8 }
  0x47   : > { %416 = vst [vmem:[%s235_s30 + $0x8] sm:$0xff] %v272_v17 }
  0x48   : > { %608 = shalt.err (!%p605_p7)
}
  0x49   : > { %s694_s4 = smov 128   ;;  %s695_s17 = smov 8  }
  0x4a   : > { %429 = dma.vmem_to_hbm [thread:$0]  (%p775_p12), %s294_s6, 256, %s296_s29, %s281_s3, %s694_s4, %s694_s4, %s695_s17  }
  0x4b PF: > { %s310_s18 = sand.u32 1, %s660_s9   ;;  %p439_p9 = pnand %p403_p13, %p780_p0 }
  0x4c   : > { %s311_s20 = scalar_lea.sflag [#allocation4], %s310_s18 }
  0x4d   : > { %p440_p10 = pneg %p439_p9 }
  0x4f   : > { %654 = dma.done.wait (%p440_p10), %s311_s20, 256  }
  0x50   : > { %656 = vsyncadd (%p440_p10), %s311_s20, 4294967040  ;;  %s21_s16 = sadd.s32 1, %s688_s16   ;;  %s892_s9 = smov %s664_s10 }
  0x51   : > { %p18_p3 = scmp.ge.s32.totalorder %s21_s16, 4   ;;  %s893_s10 = smov %s668_s11 }
  0x52   : > { %s894_s11 = smov %s769_s24  ;;  %s895_s12 = smov %s676_s13 }
  0x53   : > { %s873_s13 = smov 0   ;;  %s896_s14 = smov %s684_s15 }
  0x54   : > { %s897_s15 = smov %s899_s19  ;;  %20 = sbr.rel (!%p18_p3) target bundleno = 9 (0x9), region = 91 }
  0x59   :  { %317 = vsyncpa [#allocation3], 1 }
  0x5a   :  { %319 = vsyncpa [#allocation3 + $0x1], 1 }
  0x5b   :  { %320 = vsyncpa [#allocation6], 1 }
  0x5c   :  { %322 = vsyncpa [#allocation6 + $0x1], 1 }
  0x5d   :  { %323 = vsyncpa [#allocation4], 1 }
  0x5e   :  { %325 = vsyncpa [#allocation4 + $0x1], 1 }

</bundles_post_ra>
